<compile_context>
chip_gen: v5e
topology: v5e:2x2
jax: 0.10.0
libtpu: 0.0.40
codegen_flags: <defaults>
</compile_context>

<pallas_src>
import functools

import jax
import jax.numpy as jnp
from jax import lax
from jax.experimental import pallas as pl
from jax.experimental.pallas import tpu as pltpu

_LANES = 128
_SUBLANES = 8
_STRIP_ROWS = 512            # strip-mine unit inside a block (256 KiB of f32)
_DEFAULT_BLOCK_ROWS = 8192   # 4 MiB per f32 input buffer


def _num_core_splits():
    """2 on multi-TensorCore chips (v4 / v5p / v7x), 1 on single-TC chips."""
    try:
        kind = jax.devices()[0].device_kind.lower()
    except Exception:
        return 1
    if "lite" in kind or "v5e" in kind or "v6e" in kind:
        return 1
    if any(tag in kind for tag in ("v4", "v5p", "7x")):
        return 2
    return 1


def _xtanh_partial_kernel(rows_k, block_rows, strip_rows, blocks_per_split,
                          y_ref, yp_ref, o_ref):
    """Accumulates per-core-split partial sums of (y - y') * tanh(y - y').

    Grid: (core_split, block).  o_ref is a (1, 8, 128) f32 partial-sum slab,
    resident across the inner ("arbitrary") block axis; one slab per split.
    """
    c = pl.program_id(0)
    i = pl.program_id(1)

    @pl.when(i == 0)
    def _():
        o_ref[...] = jnp.zeros_like(o_ref)

    n_strips = block_rows // strip_rows
    row_start = (c * blocks_per_split + i) * block_rows

    def block_sum(masked):
        # Strip-mined accumulation: live ranges are a few strip-sized f32
        # temporaries, not whole-block multi-MiB intermediates.
        def body(s, acc):
            r0 = pl.multiple_of(s * strip_rows, strip_rows)
            d = (y_ref[pl.ds(r0, strip_rows), :].astype(jnp.float32)
                 - yp_ref[pl.ds(r0, strip_rows), :].astype(jnp.float32))
            val = d * jnp.tanh(d)
            if masked:
                # Select (not multiply) so NaN/Inf in OOB padding can't leak.
                rid = row_start + r0 + lax.broadcasted_iota(
                    jnp.int32, (strip_rows, _LANES), 0)
                val = jnp.where(rid < rows_k, val, 0.0)
            # Reduce only along the strip-row axis: elementwise VPU adds of
            # whole vregs, no per-step cross-lane/sublane XLU work.
            return acc + val.reshape(
                strip_rows // _SUBLANES, _SUBLANES, _LANES).sum(axis=0)

        return lax.fori_loop(0, n_strips, body,
                             jnp.zeros((_SUBLANES, _LANES), jnp.float32),
                             unroll=True)

    is_full = row_start + block_rows <= rows_k   # interior block: no mask
    is_live = row_start < rows_k                 # False only for clamped OOB

    @pl.when(is_full)
    def _():
        o_ref[...] += block_sum(masked=False)[None]

    @pl.when(jnp.logical_and(is_live, jnp.logical_not(is_full)))
    def _():
        o_ref[...] += block_sum(masked=True)[None]


def xtanh_loss(y_t, y_prime_t, *, block_rows=_DEFAULT_BLOCK_ROWS):
    assert y_t.shape == y_prime_t.shape, "inputs must have identical shapes"
    n = int(y_t.size)
    out_dtype = jnp.result_type(y_t.dtype, y_prime_t.dtype)

    if n == 0:
        # torch.mean of an empty tensor is NaN; match that.
        return jnp.full((), jnp.nan, out_dtype)

    yf = jnp.ravel(y_t)
    ypf = jnp.ravel(y_prime_t)

    rows = n // _LANES                                # full 128-lane rows
    rows_k = (rows // _SUBLANES) * _SUBLANES          # kernel-handled rows
    n_kernel = rows_k * _LANES
    # < 8*128 + 128 trailing elements handled with plain jnp below.

    total = jnp.zeros((), jnp.float32)

    if rows_k > 0:
        # Block sizing: multiple of the strip size when large, multiple of 8
        # always; shrink for small inputs.
        br_cap = min(block_rows, rows_k)
        if br_cap >= _STRIP_ROWS:
            br = (br_cap // _STRIP_ROWS) * _STRIP_ROWS
            strip = _STRIP_ROWS
        else:
            br = br_cap
            strip = br_cap

        blocks_total = pl.cdiv(rows_k, br)
        splits = _num_core_splits() if blocks_total > 1 else 1
        blocks_per_split = pl.cdiv(blocks_total, splits)
        last_block = blocks_total - 1

        # Lane-dense (rows_k, 128) view.  When n is a multiple of 1024 this is
        # a free reshape; otherwise allow_input_fusion lets XLA fuse the slice
        # into the Pallas input DMA instead of copying the arrays in HBM.
        y2 = yf[:n_kernel].reshape(rows_k, _LANES)
        yp2 = ypf[:n_kernel].reshape(rows_k, _LANES)

        def in_map(c, i):
            # Clamp fully-out-of-range logical blocks onto the last real
            # block; the kernel skips their compute entirely.
            return (jnp.minimum(c * blocks_per_split + i, last_block), 0)

        # 2 inputs x double-buffer, plus headroom for strip temporaries and
        # the tiny accumulator output.  Stays well under v7x's 64 MiB VMEM,
        # and explicitly above v5e's 16 MiB default scoped limit.
        buf_bytes = 2 * br * _LANES * (y2.dtype.itemsize + yp2.dtype.itemsize)
        vmem_limit = int(min(64 << 20, buf_bytes + (16 << 20)))

        cost = pl.CostEstimate(
            flops=3 * n_kernel,
            transcendentals=n_kernel,
            bytes_accessed=(n_kernel * (y2.dtype.itemsize + yp2.dtype.itemsize)
                            + splits * _SUBLANES * _LANES * 4),
        )

        partials = pl.pallas_call(
            functools.partial(_xtanh_partial_kernel, rows_k, br, strip,
                              blocks_per_split),
            out_shape=jax.ShapeDtypeStruct(
                (splits, _SUBLANES, _LANES), jnp.float32),
            grid_spec=pltpu.PrefetchScalarGridSpec(
                num_scalar_prefetch=0,
                grid=(splits, blocks_per_split),
                in_specs=[
                    pl.BlockSpec((br, _LANES), in_map),
                    pl.BlockSpec((br, _LANES), in_map),
                ],
                out_specs=pl.BlockSpec(
                    (1, _SUBLANES, _LANES), lambda c, i: (c, 0, 0)),
            ),
            compiler_params=pltpu.CompilerParams(
                dimension_semantics=("parallel", "arbitrary"),
                vmem_limit_bytes=vmem_limit,
                allow_input_fusion=[True, True],
            ),
            cost_estimate=cost,
        )(y2, yp2)
        total = total + jnp.sum(partials)

    if n_kernel < n:
        d_tail = (yf[n_kernel:].astype(jnp.float32)
                  - ypf[n_kernel:].astype(jnp.float32))
        total = total + jnp.sum(d_tail * jnp.tanh(d_tail))

    return (total / n).astype(out_dtype)


if __name__ == "__main__":
    key = jax.random.PRNGKey(0)
    k1, k2 = jax.random.split(key)

    def ref_loss(a, b):
        d = a.astype(jnp.float32) - b.astype(jnp.float32)
        return jnp.mean(d * jnp.tanh(d))

    # Primary example (NCHW-style); n % 1024 == 0 -> pure unmasked kernel path.
    shape = (2, 4, 16, 16)
    y_t = jax.random.normal(k1, shape, dtype=jnp.float32)
    y_prime_t = jax.random.normal(k2, shape, dtype=jnp.float32)
    loss = jax.block_until_ready(xtanh_loss(y_t, y_prime_t))
    ref = ref_loss(y_t, y_prime_t)
    assert jnp.allclose(loss, ref, rtol=1e-5, atol=1e-6), (loss, ref)

    # Ragged size: exercises the masked straddling block, the core-split /
    # clamped-block logic, and the <8-row + <128-element jnp tail.
    k3, k4 = jax.random.split(k1)
    a = jax.random.normal(k3, (610, 126), dtype=jnp.float32)  # 76860 elements
    b = jax.random.normal(k4, (610, 126), dtype=jnp.float32)
    loss2 = jax.block_until_ready(xtanh_loss(a, b))
    ref2 = ref_loss(a, b)
    assert jnp.allclose(loss2, ref2, rtol=1e-5, atol=1e-6), (loss2, ref2)

    print("KERNEL_OK")
</pallas_src>

<mosaic_0001>
module attributes {stable_mosaic.version = 11 : i64} {
  func.func @_xtanh_partial_kernel(%arg0: i32, %arg1: i32, %arg2: memref<16x128xf32, #tpu.memory_space<vmem>>, %arg3: memref<16x128xf32, #tpu.memory_space<vmem>>, %arg4: memref<1x8x128xf32, #tpu.memory_space<vmem>>) attributes {dimension_semantics = [#tpu.dimension_semantics<parallel>, #tpu.dimension_semantics<arbitrary>], iteration_bounds = array<i64: 1, 1>, scalar_prefetch = 0 : i64, scratch_operands = 0 : i64, tpu.core_type = #tpu.core_type<tc>, window_params = [{transform_indices = @transform_0, window_bounds = array<i64: 16, 128>}, {transform_indices = @transform_1, window_bounds = array<i64: 16, 128>}, {transform_indices = @transform_2, window_bounds = array<i64: 1, 8, 128>}]} {
    %c0_i32 = arith.constant 0 : i32
    %0 = arith.cmpi eq, %arg1, %c0_i32 : i32
    %1 = arith.extui %0 : i1 to i32
    %c0_i32_0 = arith.constant 0 : i32
    %2 = arith.cmpi ne, %1, %c0_i32_0 : i32
    scf.if %2 {
      %cst = arith.constant 0.000000e+00 : f32
      %15 = vector.broadcast %cst : f32 to vector<1x8x128xf32>
      %c0 = arith.constant 0 : index
      %c0_6 = arith.constant 0 : index
      %c0_7 = arith.constant 0 : index
      %16 = vector.load %arg4[%c0, %c0_6, %c0_7] : memref<1x8x128xf32, #tpu.memory_space<vmem>>, vector<1x8x128xf32>
      tpu.vector_store %arg4[%c0, %c0_6, %c0_7], %15 {strides = array<i32>} : memref<1x8x128xf32, #tpu.memory_space<vmem>>, vector<1x8x128xf32>,
    } else {
    }
    %c1_i32 = arith.constant 1 : i32
    %3 = arith.muli %arg0, %c1_i32 : i32
    %4 = arith.addi %3, %arg1 : i32
    %c16_i32 = arith.constant 16 : i32
    %5 = arith.muli %4, %c16_i32 : i32
    %c16_i32_1 = arith.constant 16 : i32
    %6 = arith.addi %5, %c16_i32_1 : i32
    %c16_i32_2 = arith.constant 16 : i32
    %7 = arith.cmpi sle, %6, %c16_i32_2 : i32
    %c16_i32_3 = arith.constant 16 : i32
    %8 = arith.cmpi slt, %5, %c16_i32_3 : i32
    %9 = arith.extui %7 : i1 to i32
    %c0_i32_4 = arith.constant 0 : i32
    %10 = arith.cmpi ne, %9, %c0_i32_4 : i32
    scf.if %10 {
      %c0 = arith.constant 0 : index
      %c0_6 = arith.constant 0 : index
      %c0_7 = arith.constant 0 : index
      %15 = vector.load %arg4[%c0, %c0_6, %c0_7] : memref<1x8x128xf32, #tpu.memory_space<vmem>>, vector<1x8x128xf32>
      %cst = arith.constant 0.000000e+00 : f32
      %16 = vector.broadcast %cst : f32 to vector<8x128xf32>
      %c0_i32_8 = arith.constant 0 : i32
      %c16_i32_9 = arith.constant 16 : i32
      %17 = arith.muli %c0_i32_8, %c16_i32_9 : i32
      %18 = tpu.assume_multiple %17, 16 : i32
      %19 = arith.index_cast %18 : i32 to index
      %c0_10 = arith.constant 0 : index
      %20 = vector.load %arg2[%19, %c0_10] : memref<16x128xf32, #tpu.memory_space<vmem>>, vector<16x128xf32>
      %21 = arith.index_cast %18 : i32 to index
      %c0_11 = arith.constant 0 : index
      %22 = vector.load %arg3[%21, %c0_11] : memref<16x128xf32, #tpu.memory_space<vmem>>, vector<16x128xf32>
      %23 = arith.subf %20, %22 : vector<16x128xf32>
      %24 = math.tanh %23 : vector<16x128xf32>
      %25 = arith.mulf %23, %24 : vector<16x128xf32>
      %26 = vector.shape_cast %25 : vector<16x128xf32> to vector<2x8x128xf32>
      %cst_12 = arith.constant dense<0.000000e+00> : vector<8x128xf32>
      %27 = vector.multi_reduction <add>, %26, %cst_12 [0] : vector<2x8x128xf32> to vector<8x128xf32>
      %28 = arith.addf %16, %27 : vector<8x128xf32>
      %c1_i32_13 = arith.constant 1 : i32
      %29 = vector.shape_cast %28 : vector<8x128xf32> to vector<1x8x128xf32>
      %30 = arith.addf %15, %29 : vector<1x8x128xf32>
      %c0_14 = arith.constant 0 : index
      %c0_15 = arith.constant 0 : index
      %c0_16 = arith.constant 0 : index
      %31 = vector.load %arg4[%c0_14, %c0_15, %c0_16] : memref<1x8x128xf32, #tpu.memory_space<vmem>>, vector<1x8x128xf32>
      tpu.vector_store %arg4[%c0_14, %c0_15, %c0_16], %30 {strides = array<i32>} : memref<1x8x128xf32, #tpu.memory_space<vmem>>, vector<1x8x128xf32>,
    } else {
    }
    %true = arith.constant true
    %11 = arith.xori %7, %true : i1
    %12 = arith.andi %8, %11 : i1
    %13 = arith.extui %12 : i1 to i32
    %c0_i32_5 = arith.constant 0 : i32
    %14 = arith.cmpi ne, %13, %c0_i32_5 : i32
    scf.if %14 {
      %c0 = arith.constant 0 : index
      %c0_6 = arith.constant 0 : index
      %c0_7 = arith.constant 0 : index
      %15 = vector.load %arg4[%c0, %c0_6, %c0_7] : memref<1x8x128xf32, #tpu.memory_space<vmem>>, vector<1x8x128xf32>
      %cst = arith.constant 0.000000e+00 : f32
      %16 = vector.broadcast %cst : f32 to vector<8x128xf32>
      %c0_i32_8 = arith.constant 0 : i32
      %c16_i32_9 = arith.constant 16 : i32
      %17 = arith.muli %c0_i32_8, %c16_i32_9 : i32
      %18 = tpu.assume_multiple %17, 16 : i32
      %19 = arith.index_cast %18 : i32 to index
      %c0_10 = arith.constant 0 : index
      %20 = vector.load %arg2[%19, %c0_10] : memref<16x128xf32, #tpu.memory_space<vmem>>, vector<16x128xf32>
      %21 = arith.index_cast %18 : i32 to index
      %c0_11 = arith.constant 0 : index
      %22 = vector.load %arg3[%21, %c0_11] : memref<16x128xf32, #tpu.memory_space<vmem>>, vector<16x128xf32>
      %23 = arith.subf %20, %22 : vector<16x128xf32>
      %24 = math.tanh %23 : vector<16x128xf32>
      %25 = arith.mulf %23, %24 : vector<16x128xf32>
      %26 = arith.addi %5, %18 : i32
      %27 = tpu.iota {dimensions = array<i32: 0>} : vector<16x128xi32>
      %28 = vector.broadcast %26 : i32 to vector<16x128xi32>
      %29 = arith.addi %28, %27 : vector<16x128xi32>
      %c16_i32_12 = arith.constant 16 : i32
      %30 = vector.broadcast %c16_i32_12 : i32 to vector<16x128xi32>
      %31 = arith.cmpi slt, %29, %30 : vector<16x128xi32>
      %cst_13 = arith.constant 0.000000e+00 : f32
      %32 = vector.broadcast %cst_13 : f32 to vector<16x128xf32>
      %33 = arith.select %31, %25, %32 : vector<16x128xi1>, vector<16x128xf32>
      %34 = vector.shape_cast %33 : vector<16x128xf32> to vector<2x8x128xf32>
      %cst_14 = arith.constant dense<0.000000e+00> : vector<8x128xf32>
      %35 = vector.multi_reduction <add>, %34, %cst_14 [0] : vector<2x8x128xf32> to vector<8x128xf32>
      %36 = arith.addf %16, %35 : vector<8x128xf32>
      %c1_i32_15 = arith.constant 1 : i32
      %37 = vector.shape_cast %36 : vector<8x128xf32> to vector<1x8x128xf32>
      %38 = arith.addf %15, %37 : vector<1x8x128xf32>
      %c0_16 = arith.constant 0 : index
      %c0_17 = arith.constant 0 : index
      %c0_18 = arith.constant 0 : index
      %39 = vector.load %arg4[%c0_16, %c0_17, %c0_18] : memref<1x8x128xf32, #tpu.memory_space<vmem>>, vector<1x8x128xf32>
      tpu.vector_store %arg4[%c0_16, %c0_17, %c0_18], %38 {strides = array<i32>} : memref<1x8x128xf32, #tpu.memory_space<vmem>>, vector<1x8x128xf32>,
    } else {
    }
    return
  }
  func.func @transform_0(%arg0: i32, %arg1: i32) -> (i32, i32) {
    %c1_i32 = arith.constant 1 : i32
    %0 = arith.muli %arg0, %c1_i32 : i32
    %1 = arith.addi %0, %arg1 : i32
    %c0_i32 = arith.constant 0 : i32
    %2 = arith.minsi %1, %c0_i32 : i32
    %c0_i32_0 = arith.constant 0 : i32
    %c0_i32_1 = arith.constant 0 : i32
    return %2, %c0_i32_0 : i32, i32
  }
  func.func @transform_1(%arg0: i32, %arg1: i32) -> (i32, i32) {
    %c1_i32 = arith.constant 1 : i32
    %0 = arith.muli %arg0, %c1_i32 : i32
    %1 = arith.addi %0, %arg1 : i32
    %c0_i32 = arith.constant 0 : i32
    %2 = arith.minsi %1, %c0_i32 : i32
    %c0_i32_0 = arith.constant 0 : i32
    %c0_i32_1 = arith.constant 0 : i32
    return %2, %c0_i32_0 : i32, i32
  }
  func.func @transform_2(%arg0: i32, %arg1: i32) -> (i32, i32, i32) {
    %c0_i32 = arith.constant 0 : i32
    %c0_i32_0 = arith.constant 0 : i32
    %c0_i32_1 = arith.constant 0 : i32
    return %arg0, %c0_i32, %c0_i32_0 : i32, i32, i32
  }
}

</mosaic_0001>

<bundles_post_ra>
// kernel: tpu_custom_call.1
= control target key start
LH: loop header
LB: loop body
LE: loop exit
PB: predicated region body
PF: predicated region fallthrough
CT: control target
= control target key end

     0   :  { %7 = vsyncpa [#allocation3], 0  ;;  %s262_s0 = inlined_call_operand.hbm [shape: f32[16,128], index: 0, kind: input, shape index: {}]   ;;  %s263_s1 = inlined_call_operand.hbm [shape: f32[16,128], index: 1, kind: input, shape index: {}]   ;;  %s264_s2 = inlined_call_operand.hbm [shape: f32[1,8,128], index: 2, kind: output, shape index: {}]  }
   0x1   :  { %8 = vsyncpa [#allocation6], 0 }
   0x2   :  { %9 = vsyncpa [#allocation4], 0  ;;  %s20_s11 = sshll.u32 %s262_s0, 4  ;;  %s233_s12 = smov [#allocation2]   ;;  %s21_s11 = int_to_ptr.hbm [resolvable:$true] %s20_s11 }
   0x3   :  { %s22_s13 = sshll.u32 %s233_s12, 4  ;;  %s39_s16 = sshll.u32 %s263_s1, 4  ;;  %s23_s13 = int_to_ptr.vmem [resolvable:$true] %s22_s13  ;;  %s40_s16 = int_to_ptr.hbm [resolvable:$true] %s39_s16 }
   0x4   :  { %s234_s17 = smov 128   ;;  %s235_s18 = smov 8  }
   0x5   :  { %28 = dma.hbm_to_vmem [thread:$0]  %s21_s11, 256, %s23_s13, [#allocation3], %s234_s17, %s234_s17, %s235_s18  }
   0x6   :  { %s236_s19 = smov [#allocation5]  }
   0x7   :  { %s41_s20 = sshll.u32 %s236_s19, 4  ;;  %s42_s20 = int_to_ptr.vmem [resolvable:$true] %s41_s20 }
   0x8   :  { %47 = dma.hbm_to_vmem [thread:$0]  %s40_s16, 256, %s42_s20, [#allocation6], %s234_s17, %s234_s17, %s235_s18  }
   0x9   :  { %227 = dma.done.wait [#allocation3], 256  }
   0xa   :  { %228 = vsyncadd [#allocation3], 4294967040 }
   0xb   :  { %229 = dma.done.wait [#allocation6], 256  }
   0xc   :  { %230 = vsyncadd [#allocation6], 4294967040  ;;  %v78_v0 = vld [vmem:[#allocation2] sm:$0xff]  ;;  %v79_v1 = vld [vmem:[#allocation2 + $0x8] sm:$0xff]  ;;  %s237_s0 = smov [#allocation7]   ;;  %s130_s23 = sshll.u32 %s264_s2, 4  ;;  %s131_s23 = int_to_ptr.hbm [resolvable:$true] %s130_s23 }
   0xd   :  { %v80_v2 = vld [vmem:[#allocation5] sm:$0xff]  ;;  %v81_v3 = vld [vmem:[#allocation5 + $0x8] sm:$0xff]  ;;  %s128_s1 = sshll.u32 %s237_s0, 4  ;;  %s129_s1 = int_to_ptr.vmem [resolvable:$true] %s128_s1 }
   0xe   :  { %v82_v4 = vsub.f32 %v78_v0, %v80_v2  ;;  %v83_v5 = vsub.f32 %v79_v1, %v81_v3 }
  0x10   :  { %151 = vtanh.f32 %v82_v4 }
  0x11   :  { %153 = vtanh.f32 %v83_v5 }
  0x16   :  { %v152_v6 = vpop.eup %151 }
  0x17   :  { %v154_v7 = vpop.eup %153  ;;  %v86_v8 = vmul.f32 %v152_v6, %v82_v4 }
  0x18   :  { %v87_v9 = vmul.f32 %v154_v7, %v83_v5 }
  0x1a   :  { %v88_v10 = vadd.f32 %v87_v9, %v86_v8 }
  0x1c   :  { %91 = vst [vmem:[#allocation7] sm:$0xff] %v88_v10 }
  0x1d   :  { %133 = dma.vmem_to_hbm [thread:$0]  %s129_s1, 128, %s131_s23, [#allocation4]  }
  0x1e   :  { %231 = dma.done.wait [#allocation4], 128  }
  0x1f   :  { %232 = vsyncadd [#allocation4], 4294967168 }
  0x20   :  { %138 = vsyncpa [#allocation3], 1 }
  0x21   :  { %139 = vsyncpa [#allocation6], 1 }
  0x22   :  { %140 = vsyncpa [#allocation4], 1 }

</bundles_post_ra>
